<compile_context>
chip_gen: v7x
topology: tpu7x:2x2x1
jax: 0.10.0
libtpu: 0.0.40
codegen_flags: <defaults>
</compile_context>

<pallas_src>
import functools

import jax
import jax.numpy as jnp
from jax.experimental import pallas as pl
from jax.experimental.pallas import tpu as pltpu

BN_EPS = 1e-5


def _mlp_kernel(x_ref, w1_ref, b1_ref, w2_ref, b2_ref,
                w3_ref, b3_ref, w4_ref, b4_ref, out_ref):
    # x arrives as (8, tile_n): features on sublanes, batch on lanes.
    # All activations are (features, tile_n); final store is a lane-dense
    # (1, tile_n) row.  No transposes anywhere in the kernel.
    xt = x_ref[...]                                                 # (8, tile_n)
    h = jnp.tanh(jnp.dot(w1_ref[...], xt,
                         preferred_element_type=jnp.float32) + b1_ref[...])
    h = jnp.tanh(jnp.dot(w2_ref[...], h,
                         preferred_element_type=jnp.float32) + b2_ref[...])
    h = jnp.tanh(jnp.dot(w3_ref[...], h,
                         preferred_element_type=jnp.float32) + b3_ref[...])
    out_ref[...] = (jnp.dot(w4_ref[...], h,
                            preferred_element_type=jnp.float32)
                    + b4_ref[...]).astype(out_ref.dtype)


def _round_up(a, b):
    return ((a + b - 1) // b) * b


def _choose_tile(n, tile_n):
    """Lane-aligned (128) tile; prefer an even block count for megacore balance."""
    if n < 256:
        return n                                    # single full-extent block
    if n <= tile_n:
        half = _round_up((n + 1) // 2, 128)         # two balanced blocks
        return half if half < n else n
    blocks = pl.cdiv(n, tile_n)
    blocks += blocks % 2                            # even number of blocks
    return min(tile_n, _round_up(pl.cdiv(n, blocks), 128))


@functools.partial(jax.jit, static_argnames=("tile_n",))
def model_forward(x, params, *, tile_n=32768):
    """x: (N, 8). Returns (N, 1) f32, matching the PyTorch module's forward."""
    x = x.astype(jnp.float32)
    n = x.shape[0]

    # --- BatchNorm1d training-mode stats in a single pass over x (mean and
    # E[x^2] fuse into one HBM read).  E[x^2]-mean^2 can cancel for data with
    # |mean| >> std; clamp at 0 so rsqrt never sees a negative value.
    mean = jnp.mean(x, axis=0)
    ex2 = jnp.mean(x * x, axis=0)
    var = jnp.maximum(ex2 - mean * mean, 0.0)                      # biased var
    s = params["gamma"] * jax.lax.rsqrt(var + BN_EPS)              # (8,)
    t = params["beta"] - mean * s                                  # (8,)
    # Fold the BN affine into linear1 (tiny 10x8 weight).
    w1f = params["w1"] * s[None, :]                                # (10, 8)
    b1f = params["b1"] + params["w1"] @ t[:, None]                 # (10, 1)

    # Feed x transposed: (8, N) keeps the batch dim on lanes inside the
    # kernel (lane-dense DMA/loads, no XLU relayout).  Costs one extra XLA
    # pass over x; this is the review's preferred layout fix.
    xt = x.T                                                       # (8, N)

    tile = _choose_tile(n, tile_n)
    grid = (pl.cdiv(n, tile),)

    weight_args = (w1f, b1f,
                   params["w2"], params["b2"],
                   params["w3"], params["b3"],
                   params["w4"], params["b4"])

    def resident(a):
        # Constant index_map: operand stays VMEM-resident across the grid.
        return pl.BlockSpec(a.shape, lambda i, _nd=a.ndim: (0,) * _nd)

    out_t = pl.pallas_call(
        _mlp_kernel,
        out_shape=jax.ShapeDtypeStruct((1, n), jnp.float32),
        grid=grid,
        in_specs=[pl.BlockSpec((8, tile), lambda i: (0, i))]
                 + [resident(a) for a in weight_args],
        out_specs=pl.BlockSpec((1, tile), lambda i: (0, i)),
        compiler_params=pltpu.CompilerParams(
            dimension_semantics=("parallel",),
            vmem_limit_bytes=48 * 1024 * 1024),
    )(xt, *weight_args)

    # (1, N) -> (N, 1): identical row-major data, metadata-only reshape.
    return out_t.reshape(n, 1)


def init_params(key):
    """PyTorch-default-style init. Weights stored (out, in); biases (out, 1)."""
    dims = [(8, 10), (10, 20), (20, 10), (10, 1)]
    params = {
        "gamma": jnp.ones((8,), jnp.float32),
        "beta": jnp.zeros((8,), jnp.float32),
    }
    for i, (fan_in, fan_out) in enumerate(dims, start=1):
        key, kw, kb = jax.random.split(key, 3)
        bound = 1.0 / float(fan_in) ** 0.5
        params[f"w{i}"] = jax.random.uniform(
            kw, (fan_out, fan_in), jnp.float32, -bound, bound)
        params[f"b{i}"] = jax.random.uniform(
            kb, (fan_out, 1), jnp.float32, -bound, bound)
    return params


def _reference(x, params):
    """Pure-JAX reference of the PyTorch forward (BN in training mode). (N,1)."""
    x = x.astype(jnp.float32)
    mean = jnp.mean(x, axis=0)
    var = jnp.mean(jnp.square(x - mean), axis=0)
    h = (x - mean) * jax.lax.rsqrt(var + BN_EPS) * params["gamma"] + params["beta"]
    h = jnp.tanh(h @ params["w1"].T + params["b1"][:, 0])
    h = jnp.tanh(h @ params["w2"].T + params["b2"][:, 0])
    h = jnp.tanh(h @ params["w3"].T + params["b3"][:, 0])
    return h @ params["w4"].T + params["b4"][:, 0]                 # (n, 1)


if __name__ == "__main__":
    key = jax.random.PRNGKey(0)
    key, kx, kp = jax.random.split(key, 3)
    params = init_params(kp)

    # Small single-block case and a multi-block case exercising the grid,
    # parallel dimension semantics, and the balanced two-block tiling.
    for n in (8, 1280):
        kx, sub = jax.random.split(kx)
        x = jax.random.normal(sub, (n, 8), jnp.float32)

        out = jax.block_until_ready(model_forward(x, params))
        assert out.shape == (n, 1) and out.dtype == jnp.float32

        ref = _reference(x, params)                                # (n, 1)
        max_err = float(jnp.max(jnp.abs(out - ref)))
        assert jnp.allclose(out, ref, atol=1e-4, rtol=1e-4), (
            f"mismatch at n={n}: max err {max_err}")

    print("KERNEL_OK")
</pallas_src>

<mosaic_0001>
module attributes {stable_mosaic.version = 11 : i64} {
  func.func @_mlp_kernel(%arg0: i32, %arg1: memref<8x8xf32, #tpu.memory_space<vmem>>, %arg2: memref<10x8xf32, #tpu.memory_space<vmem>>, %arg3: memref<10x1xf32, #tpu.memory_space<vmem>>, %arg4: memref<20x10xf32, #tpu.memory_space<vmem>>, %arg5: memref<20x1xf32, #tpu.memory_space<vmem>>, %arg6: memref<10x20xf32, #tpu.memory_space<vmem>>, %arg7: memref<10x1xf32, #tpu.memory_space<vmem>>, %arg8: memref<1x10xf32, #tpu.memory_space<vmem>>, %arg9: memref<1x1xf32, #tpu.memory_space<vmem>>, %arg10: memref<1x8xf32, #tpu.memory_space<vmem>>) attributes {dimension_semantics = [#tpu.dimension_semantics<parallel>], iteration_bounds = array<i64: 1>, scalar_prefetch = 0 : i64, scratch_operands = 0 : i64, tpu.core_type = #tpu.core_type<tc>, window_params = [{transform_indices = @transform_0, window_bounds = array<i64: 8, 8>}, {pipeline_mode = #tpu.pipeline_mode<synchronous>, transform_indices = @transform_1, window_bounds = array<i64: 10, 8>}, {pipeline_mode = #tpu.pipeline_mode<synchronous>, transform_indices = @transform_2, window_bounds = array<i64: 10, 1>}, {pipeline_mode = #tpu.pipeline_mode<synchronous>, transform_indices = @transform_3, window_bounds = array<i64: 20, 10>}, {pipeline_mode = #tpu.pipeline_mode<synchronous>, transform_indices = @transform_4, window_bounds = array<i64: 20, 1>}, {pipeline_mode = #tpu.pipeline_mode<synchronous>, transform_indices = @transform_5, window_bounds = array<i64: 10, 20>}, {pipeline_mode = #tpu.pipeline_mode<synchronous>, transform_indices = @transform_6, window_bounds = array<i64: 10, 1>}, {pipeline_mode = #tpu.pipeline_mode<synchronous>, transform_indices = @transform_7, window_bounds = array<i64: 1, 10>}, {pipeline_mode = #tpu.pipeline_mode<synchronous>, transform_indices = @transform_8, window_bounds = array<i64: 1, 1>}, {transform_indices = @transform_9, window_bounds = array<i64: 1, 8>}]} {
    %c0 = arith.constant 0 : index
    %c0_0 = arith.constant 0 : index
    %0 = vector.load %arg1[%c0, %c0_0] : memref<8x8xf32, #tpu.memory_space<vmem>>, vector<8x8xf32>
    %c0_1 = arith.constant 0 : index
    %c0_2 = arith.constant 0 : index
    %1 = vector.load %arg2[%c0_1, %c0_2] : memref<10x8xf32, #tpu.memory_space<vmem>>, vector<10x8xf32>
    %cst = arith.constant dense<0.000000e+00> : vector<10x8xf32>
    %2 = tpu.matmul %1, %0, %cst {dimension_numbers = #tpu.dot_dimension_numbers<[1], [0], [0], [1], [0, 0, 1, 1], [], []>} : vector<10x8xf32>, vector<8x8xf32>, vector<10x8xf32> -> vector<10x8xf32>
    %c0_3 = arith.constant 0 : index
    %c0_4 = arith.constant 0 : index
    %3 = vector.load %arg3[%c0_3, %c0_4] : memref<10x1xf32, #tpu.memory_space<vmem>>, vector<10x1xf32>
    %4 = vector.broadcast %3 : vector<10x1xf32> to vector<10x8xf32>
    %5 = arith.addf %2, %4 : vector<10x8xf32>
    %6 = math.tanh %5 : vector<10x8xf32>
    %c0_5 = arith.constant 0 : index
    %c0_6 = arith.constant 0 : index
    %7 = vector.load %arg4[%c0_5, %c0_6] : memref<20x10xf32, #tpu.memory_space<vmem>>, vector<20x10xf32>
    %cst_7 = arith.constant dense<0.000000e+00> : vector<20x8xf32>
    %8 = tpu.matmul %7, %6, %cst_7 {dimension_numbers = #tpu.dot_dimension_numbers<[1], [0], [0], [1], [0, 0, 1, 1], [], []>} : vector<20x10xf32>, vector<10x8xf32>, vector<20x8xf32> -> vector<20x8xf32>
    %c0_8 = arith.constant 0 : index
    %c0_9 = arith.constant 0 : index
    %9 = vector.load %arg5[%c0_8, %c0_9] : memref<20x1xf32, #tpu.memory_space<vmem>>, vector<20x1xf32>
    %10 = vector.broadcast %9 : vector<20x1xf32> to vector<20x8xf32>
    %11 = arith.addf %8, %10 : vector<20x8xf32>
    %12 = math.tanh %11 : vector<20x8xf32>
    %c0_10 = arith.constant 0 : index
    %c0_11 = arith.constant 0 : index
    %13 = vector.load %arg6[%c0_10, %c0_11] : memref<10x20xf32, #tpu.memory_space<vmem>>, vector<10x20xf32>
    %cst_12 = arith.constant dense<0.000000e+00> : vector<10x8xf32>
    %14 = tpu.matmul %13, %12, %cst_12 {dimension_numbers = #tpu.dot_dimension_numbers<[1], [0], [0], [1], [0, 0, 1, 1], [], []>} : vector<10x20xf32>, vector<20x8xf32>, vector<10x8xf32> -> vector<10x8xf32>
    %c0_13 = arith.constant 0 : index
    %c0_14 = arith.constant 0 : index
    %15 = vector.load %arg7[%c0_13, %c0_14] : memref<10x1xf32, #tpu.memory_space<vmem>>, vector<10x1xf32>
    %16 = vector.broadcast %15 : vector<10x1xf32> to vector<10x8xf32>
    %17 = arith.addf %14, %16 : vector<10x8xf32>
    %18 = math.tanh %17 : vector<10x8xf32>
    %c0_15 = arith.constant 0 : index
    %c0_16 = arith.constant 0 : index
    %19 = vector.load %arg8[%c0_15, %c0_16] : memref<1x10xf32, #tpu.memory_space<vmem>>, vector<1x10xf32>
    %cst_17 = arith.constant dense<0.000000e+00> : vector<1x8xf32>
    %20 = tpu.matmul %19, %18, %cst_17 {dimension_numbers = #tpu.dot_dimension_numbers<[1], [0], [0], [1], [0, 0, 1, 1], [], []>} : vector<1x10xf32>, vector<10x8xf32>, vector<1x8xf32> -> vector<1x8xf32>
    %c0_18 = arith.constant 0 : index
    %c0_19 = arith.constant 0 : index
    %21 = vector.load %arg9[%c0_18, %c0_19] : memref<1x1xf32, #tpu.memory_space<vmem>>, vector<1x1xf32>
    %22 = vector.broadcast %21 : vector<1x1xf32> to vector<1x8xf32>
    %23 = arith.addf %20, %22 : vector<1x8xf32>
    %c0_20 = arith.constant 0 : index
    %c0_21 = arith.constant 0 : index
    %24 = vector.load %arg10[%c0_20, %c0_21] : memref<1x8xf32, #tpu.memory_space<vmem>>, vector<1x8xf32>
    tpu.vector_store %arg10[%c0_20, %c0_21], %23 {strides = array<i32>} : memref<1x8xf32, #tpu.memory_space<vmem>>, vector<1x8xf32>,
    return
  }
  func.func @transform_0(%arg0: i32) -> (i32, i32) {
    %c0_i32 = arith.constant 0 : i32
    %c0_i32_0 = arith.constant 0 : i32
    return %c0_i32, %arg0 : i32, i32
  }
  func.func @transform_1(%arg0: i32) -> (i32, i32) {
    %c0_i32 = arith.constant 0 : i32
    %c0_i32_0 = arith.constant 0 : i32
    %c0_i32_1 = arith.constant 0 : i32
    return %c0_i32, %c0_i32_0 : i32, i32
  }
  func.func @transform_2(%arg0: i32) -> (i32, i32) {
    %c0_i32 = arith.constant 0 : i32
    %c0_i32_0 = arith.constant 0 : i32
    %c0_i32_1 = arith.constant 0 : i32
    return %c0_i32, %c0_i32_0 : i32, i32
  }
  func.func @transform_3(%arg0: i32) -> (i32, i32) {
    %c0_i32 = arith.constant 0 : i32
    %c0_i32_0 = arith.constant 0 : i32
    %c0_i32_1 = arith.constant 0 : i32
    return %c0_i32, %c0_i32_0 : i32, i32
  }
  func.func @transform_4(%arg0: i32) -> (i32, i32) {
    %c0_i32 = arith.constant 0 : i32
    %c0_i32_0 = arith.constant 0 : i32
    %c0_i32_1 = arith.constant 0 : i32
    return %c0_i32, %c0_i32_0 : i32, i32
  }
  func.func @transform_5(%arg0: i32) -> (i32, i32) {
    %c0_i32 = arith.constant 0 : i32
    %c0_i32_0 = arith.constant 0 : i32
    %c0_i32_1 = arith.constant 0 : i32
    return %c0_i32, %c0_i32_0 : i32, i32
  }
  func.func @transform_6(%arg0: i32) -> (i32, i32) {
    %c0_i32 = arith.constant 0 : i32
    %c0_i32_0 = arith.constant 0 : i32
    %c0_i32_1 = arith.constant 0 : i32
    return %c0_i32, %c0_i32_0 : i32, i32
  }
  func.func @transform_7(%arg0: i32) -> (i32, i32) {
    %c0_i32 = arith.constant 0 : i32
    %c0_i32_0 = arith.constant 0 : i32
    %c0_i32_1 = arith.constant 0 : i32
    return %c0_i32, %c0_i32_0 : i32, i32
  }
  func.func @transform_8(%arg0: i32) -> (i32, i32) {
    %c0_i32 = arith.constant 0 : i32
    %c0_i32_0 = arith.constant 0 : i32
    %c0_i32_1 = arith.constant 0 : i32
    return %c0_i32, %c0_i32_0 : i32, i32
  }
  func.func @transform_9(%arg0: i32) -> (i32, i32) {
    %c0_i32 = arith.constant 0 : i32
    %c0_i32_0 = arith.constant 0 : i32
    return %c0_i32, %arg0 : i32, i32
  }
}

</mosaic_0001>

<bundles_post_ra>
// kernel: model_forward.1
= control target key start
LH: loop header
LB: loop body
LE: loop exit
PB: predicated region body
PF: predicated region fallthrough
CT: control target
= control target key end

     0   :  { %s719_s0 = inlined_call_operand.vmem [shape: f32[8,8], index: 0, kind: input, shape index: {}]   ;;  %s720_s1 = inlined_call_operand.vmem [shape: f32[10,8], index: 1, kind: input, shape index: {}]   ;;  %s721_s2 = inlined_call_operand.vmem [shape: f32[10,1], index: 2, kind: input, shape index: {}]   ;;  %s722_s3 = inlined_call_operand.vmem [shape: f32[20,10], index: 3, kind: input, shape index: {}]   ;;  %s723_s4 = inlined_call_operand.vmem [shape: f32[20,1], index: 4, kind: input, shape index: {}]   ;;  %s724_s5 = inlined_call_operand.vmem [shape: f32[10,20], index: 5, kind: input, shape index: {}]   ;;  %s725_s6 = inlined_call_operand.vmem [shape: f32[10,1], index: 6, kind: input, shape index: {}]   ;;  %s726_s7 = inlined_call_operand.vmem [shape: f32[1,10], index: 7, kind: input, shape index: {}]   ;;  %s727_s8 = inlined_call_operand.<no memory space> [shape: f32[1,1], index: 8, kind: input, shape index: {}]   ;;  %s728_s9 = inlined_call_operand.hbm [shape: f32[1,8], index: 9, kind: output, shape index: {}]  }
   0x1   :  { %v14_v0 = vstv %s727_s8 }
   0x2   :  { %15 = vst [vmem:[#allocation2] sm:$0x1] %v14_v0 }
   0x3   :  { %v35_v1 = vld [vmem:[%s719_s0] sm:$0xff]  ;;  %vm50_vm0 = vcmask 64512   ;;  %v37_v3 = vld [vmem:[%s720_s1 + $0x8] sm:$0x3]  ;;  %v576_v5 = vmov 0  }
   0x4   :  { %v36_v2 = vld [vmem:[%s720_s1] sm:$0xff]  ;;  %484 = vmatprep.subr.mxu0 %v35_v1  ;;  %536 = vset.pattern.permute.xlu0 %v576_v5 }
   0x5   :  { %486 = vmatprep.mubr.msk.f32.mxu0 %vm50_vm0, %v36_v2  ;;  %v38_v4 = vld [vmem:[%s721_s2] sm:$0xff]  ;;  %485 = vmatpush3.msra.mxu0 %v35_v1 }
   0x6   :  { %16 = vsyncpa [#allocation4], 0  ;;  %487 = vmatmul.mubr.msk.f32.vlgmr.msra.gmra.mrb[0].mxu0 %vm50_vm0, %v37_v3  ;;  %42 = vperm.xlu0 %536, %v38_v4   ;;  %v39_v6 = vld [vmem:[%s721_s2 + $0x8] sm:$0x3]  ;;  %v139_v7 = vld [vmem:[%s723_s4 + $0x10] sm:$0xf]  ;;  %v361_v56 = vlaneseq }
   0x7   :  { %537 = vset.pattern.permute.xlu1 %v576_v5  ;;  %v255_v8 = vld [vmem:[%s725_s6 + $0x8] sm:$0x3]  ;;  %v577_v9 = vmov 0.0|0.0   ;;  %vm578_vm1 = vmmov 0   ;;  %v579_v10 = vmov 0.0   ;;  %v137_v11 = vld [vmem:[%s723_s4] sm:$0xff] }
   0x8   :  { %518 = vmatprep.subr.bf16.mxu1 %v577_v9  ;;  %493 = vmatprep.mubr.msk.f32.mxu1 %vm578_vm1, %v579_v10  ;;  %v138_v12 = vld [vmem:[%s723_s4 + $0x8] sm:$0xff]  ;;  %v254_v13 = vld [vmem:[%s725_s6] sm:$0xff]  ;;  %vm165_vm2 = vcmask 1041408   ;;  %vm580_vm3 = vmmov 1   ;;  %vm155_vm5 = vcmask 80896   ;;  %vm266_vm6 = vcmask 162816  }
   0x9   :  { %142 = vperm.xlu1 %537, %v137_v11   ;;  %v355_v14 = vld [vmem:[#allocation2] sm:$0x1]  ;;  %vm668_vm4 = vmpackc.low %vm165_vm2, %vm580_vm3  ;;  %v135_v26 = vld [vmem:[%s722_s3 + $0x8] sm:$0xff]  ;;  %vm273_vm7 = vcmask 1043456   ;;  %v362_v57 = vshrl.u32 %v361_v56, 7  ;;  %s581_s14 = smov [#allocation3]  }
   0xa   :  { %47 = vperm.xlu0 %536, %v39_v6   ;;  %v134_v25 = vld [vmem:[%s722_s3] sm:$0xff]  ;;  %v136_v27 = vld [vmem:[%s722_s3 + $0x10] sm:$0xf]  ;;  %v253_v45 = vld [vmem:[%s724_s5 + $0x8] sm:$0x3]  ;;  %s449_s15 = sshll.u32 %s581_s14, 4  ;;  %s450_s15 = int_to_ptr.vmem [resolvable:$true] %s449_s15 }
   0xb   :  { %v252_v28 = vld [vmem:[%s724_s5] sm:$0xff]  ;;  %v363_v58 = vsub.s32 0, %v362_v57  ;;  %vm441_vm8 = vcmask 57344   ;;  %s552_s16 = scalar_lea.vmem %s450_s15, 16  ;;  %s556_s17 = scalar_lea.vmem %s450_s15, 32 }
   0xc   :  { %508 = vmatprep.mubr.msk.f32.mxu0 %vm266_vm6, %v252_v28  ;;  %v354_v55 = vld [vmem:[%s726_s7] sm:$0x1]  ;;  %p553_p0 = scmp.ne.s32.totalorder %s450_s15, %s552_s16  ;;  %p557_p1 = scmp.lt.s32.totalorder %s450_s15, %s450_s15 }
   0xd   :  { %147 = vperm.xlu1 %537, %v138_v12   ;;  %p558_p2 = scmp.lt.s32.totalorder %s556_s17, %s552_s16 }
   0xe   :  { %152 = vperm.xlu0 %536, %v139_v7  }
   0xf   :  { %p559_p3 = por %p558_p2, %p557_p1 }
  0x11   :  { %258 = vperm.xlu1 %537, %v254_v13   ;;  %p560_p4 = pnand %p559_p3, %p553_p0 }
  0x12   :  { %263 = vperm.xlu0 %536, %v255_v8  }
  0x15   :  { %358 = vperm.xlu1 %537, %v355_v14  }
  0x85   :  { %v43_v15 = vpop.permute.xlu0 %42 }
  0x88   :  { %v143_v29 = vpop.permute.xlu1 %142 }
  0x89   :  { %v48_v16 = vpop.permute.xlu0 %47 }
  0x8c   :  { %v148_v33 = vpop.permute.xlu1 %147 }
  0x8d   :  { %v153_v37 = vpop.permute.xlu0 %152 }
  0x90   :  { %v259_v48 = vpop.permute.xlu1 %258 }
  0x91   :  { %v264_v46 = vpop.permute.xlu0 %263 }
  0x94   :  { %v359_v59 = vpop.permute.xlu1 %358 }
  0x95   :  { %v364_v60 = vrot.slane %v359_v59, %v363_v58 }
  0xd9   :  { %v488_v17 = vpop.f32.mrb[0].mxu0 }
  0xda   :  { %v129_v18 = vadd.f32 %v488_v17, %v48_v16  ;;  %v123_v19 = vpop.f32.mrb[1].mxu0 }
  0xdb   :  { %v124_v20 = vadd.f32 %v123_v19, %v43_v15 }
  0xdc   :  { %538 = vtanh.f32 %v129_v18 }
  0xdd   :  { %540 = vtanh.f32 %v124_v20 }
  0xe6   :  { %v539_v21 = vpop.eup %538 }
  0xe7   :  { %v541_v22 = vpop.eup %540 }
  0xe8   :  { %v519_v24 = vpack.c.bf16 %v539_v21, %v541_v22 }
  0xea   :  { %521 = vmatpush3.bf16.msk.msra.mxu1 %vm668_vm4, %v519_v24 }
  0xed   :  { %494 = vmatmul.mubr.msk.f32.vlgmr.msra.gmra.mrb[0].mxu1 %vm155_vm5, %v134_v25 }
  0xee   :  { %496 = vmatprep.mubr.msk.f32.mxu1 %vm578_vm1, %v579_v10 }
  0xf1   :  { %497 = vmatmul.mubr.msk.f32.gmra.mrb[2].mxu1 %vm155_vm5, %v135_v26 }
  0xf2   :  { %499 = vmatprep.mubr.msk.f32.mxu1 %vm578_vm1, %v579_v10 }
  0xf5   :  { %500 = vmatmul.mubr.msk.f32.gmra.mrb[4].mxu1 %vm155_vm5, %v136_v27 }
 0x1c0   :  { %v235_v30 = vpop.f32.mrb[0].mxu1 }
 0x1c1   :  { %v495_v31 = vpop.f32.mrb[1].mxu1  ;;  %v236_v32 = vadd.f32 %v235_v30, %v143_v29 }
 0x1c3   :  { %542 = vtanh.f32 %v236_v32 }
 0x1c4   :  { %v240_v34 = vpop.f32.mrb[2].mxu1 }
 0x1c5   :  { %v241_v35 = vadd.f32 %v240_v34, %v148_v33  ;;  %v498_v36 = vpop.f32.mrb[3].mxu1 }
 0x1c7   :  { %544 = vtanh.f32 %v241_v35 }
 0x1c8   :  { %v245_v38 = vpop.f32.mrb[4].mxu1 }
 0x1c9   :  { %v246_v39 = vadd.f32 %v245_v38, %v153_v37  ;;  %v501_v40 = vpop.f32.mrb[5].mxu1 }
 0x1cb   :  { %546 = vtanh.f32 %v246_v39 }
 0x1cd   :  { %v543_v41 = vpop.eup %542 }
 0x1d1   :  { %v545_v42 = vpop.eup %544 }
 0x1d2   :  { %v522_v43 = vpack.c.bf16 %v545_v42, %v543_v41 }
 0x1d4   :  { %523 = vmatprep.subr.bf16.mxu0 %v522_v43 }
 0x1d5   :  { %v547_v44 = vpop.eup %546  ;;  %525 = vmatpush3.bf16.msra.mxu0 %v522_v43 }
 0x1d6   :  { %506 = vmatprep.subr.msk.mxu0 %vm273_vm7, %v547_v44 }
 0x1d9   :  { %507 = vmatpush3.msk.msra.mxu0 %vm273_vm7, %v547_v44 }
 0x1da   :  { %509 = vmatmul.mubr.msk.f32.vlgmr.msra.gmra.mrb[2].mxu0 %vm266_vm6, %v253_v45  ;;  %526 = vmatprep.subr.bf16.mxu0 %v577_v9 }
 0x1db   :  { %515 = vmatprep.mubr.msk.f32.mxu0 %vm578_vm1, %v579_v10 }
 0x2ad   :  { %v510_v47 = vpop.f32.mrb[2].mxu0 }
 0x2ae   :  { %v349_v49 = vadd.f32 %v510_v47, %v264_v46  ;;  %v343_v50 = vpop.f32.mrb[3].mxu0 }
 0x2af   :  { %v344_v51 = vadd.f32 %v343_v50, %v259_v48 }
 0x2b0   :  { %548 = vtanh.f32 %v349_v49 }
 0x2b1   :  { %550 = vtanh.f32 %v344_v51 }
 0x2ba   :  { %v549_v52 = vpop.eup %548 }
 0x2bb   :  { %v551_v53 = vpop.eup %550 }
 0x2bc   :  { %v527_v54 = vpack.c.bf16 %v549_v52, %v551_v53 }
 0x2be   :  { %529 = vmatpush3.bf16.msk.msra.mxu0 %vm668_vm4, %v527_v54 }
 0x2c1   :  { %516 = vmatmul.mubr.msk.f32.vlgmr.msra.gmra.mrb[4].mxu0 %vm155_vm5, %v354_v55 }
 0x394   :  { %v437_v61 = vpop.f32.mrb[4].mxu0 }
 0x395   :  { %v438_v62 = vadd.f32 %v437_v61, %v364_v60  ;;  %v517_v63 = vpop.f32.mrb[5].mxu0 }
 0x397   :  { %442 = vst.msk [vmem:[#allocation3] sm:$0x1] %vm441_vm8, %v438_v62 }
 0x398   :  { %563 = shalt.err (!%p560_p4)
}
 0x399   :  { %s564_s0 = scalar_lea.hbm %s728_s9, 16 }
 0x39a   :  { %p565_p5 = scmp.ne.s32.totalorder %s728_s9, %s564_s0  ;;  %p568_p6 = scmp.lt.u32.totalorder %s564_s0, %s728_s9 }
 0x39c   :  { %p570_p7 = pnand %p568_p6, %p565_p5 }
 0x39e   :  { %573 = shalt.err (!%p570_p7)
}
 0x39f   :  { %452 = dma.vmem_to_hbm [thread:$0]  %s450_s15, 16, %s728_s9, [#allocation4]  }
 0x3a0   :  { %574 = dma.done.wait [#allocation4], 16  }
 0x3a1   :  { %575 = vsyncadd [#allocation4], 4294967280 }
 0x3a2   :  { %456 = vsyncpa [#allocation4], 1 }

</bundles_post_ra>
